<compile_context>
chip_gen: v7x
topology: tpu7x:2x2x1
jax: 0.10.0
libtpu: 0.0.40
codegen_flags: <defaults>
</compile_context>

<pallas_src>
import functools

import jax
import jax.numpy as jnp
from jax.experimental import pallas as pl
from jax.experimental.pallas import tpu as pltpu


# For ConvTranspose2d(k=3, s=2, p=1, op=1):
#   out[2q + r] receives x[q + d] through kernel tap _TAP[(r, d)]  (None = no tap)
_TAP = {(0, 0): 1, (0, 1): None, (1, 0): 2, (1, 1): 0}


# ---------------------------------------------------------------------------
# Fused kernel: whole batch in the lane axis, pure matmul chain + XLU rolls.
# ---------------------------------------------------------------------------
def _fused_decoder_kernel(x_ref, w1_ref, b1_ref, w2_ref, b2_ref, mask_ref,
                          o_ref, *, deltas, lanes):
    # x_ref   : (Cin, L)        input, L = N*H*W in lanes (n-major)
    # w1_ref  : (4*Cmid, 4*Cin) layer-1 phase weights
    # b1_ref  : (4*Cmid, 1)
    # w2_ref  : (16*Cout, 16*Cmid) layer-2 weights, all 4 coarse shifts concat'd
    # b2_ref  : (16*Cout, 1)
    # mask_ref: (4, 1, L)       boundary masks for the coarse shifts g=(gy,gx)
    # o_ref   : (16*Cout, L)    sub-pixel output slab
    # Positive roll amount (lanes - delta) % lanes  ==  roll by -delta, i.e.
    # rolled[:, l] = src[:, l + delta]; out-of-range / cross-batch lanes are
    # exactly the masked ones.
    shifts = tuple((lanes - d) % lanes for d in deltas)

    x = x_ref[...]                                              # (Cin, L)

    # Build the 4 shifted input-column copies in-kernel (g = (dy, dx)).
    xcols = [x]
    for g in (1, 2, 3):
        xcols.append(pltpu.roll(x, shifts[g], axis=1) * mask_ref[g])
    xcols = jnp.concatenate(xcols, axis=0)                      # (4*Cin, L)

    # Layer 1: all 4 output phases in one matmul, bias + ReLU fused.
    mid = jnp.dot(w1_ref[...], xcols, preferred_element_type=jnp.float32)
    mid = jnp.maximum(mid + b1_ref[...], 0.0)                   # (4*Cmid, L)

    # Layer 2: stack the 4 coarse-shifted copies of mid along sublanes and do
    # a single K = 4*4*Cmid (=256) matmul.
    stack = [mid]
    for g in (1, 2, 3):
        stack.append(pltpu.roll(mid, shifts[g], axis=1) * mask_ref[g])
    mid4 = jnp.concatenate(stack, axis=0)                       # (16*Cmid, L)

    out = jnp.dot(w2_ref[...], mid4, preferred_element_type=jnp.float32)
    o_ref[...] = jax.nn.sigmoid(out + b2_ref[...])


# ---------------------------------------------------------------------------
# One-time weight packing (hoisted out of the per-call path).
# ---------------------------------------------------------------------------
def _build_layer1_weight(w1, b1):
    """Pack (Cin, Cmid, 3, 3) deconv weight into (4*Cmid, 4*Cin) phase matrix."""
    cin, cmid = w1.shape[0], w1.shape[1]
    row_blocks = []
    for ry in (0, 1):
        for rx in (0, 1):
            col_blocks = []
            for dy in (0, 1):
                for dx in (0, 1):
                    ky, kx = _TAP[(ry, dy)], _TAP[(rx, dx)]
                    if ky is None or kx is None:
                        col_blocks.append(jnp.zeros((cmid, cin), w1.dtype))
                    else:
                        col_blocks.append(w1[:, :, ky, kx].T)
            row_blocks.append(jnp.concatenate(col_blocks, axis=1))
    return jnp.concatenate(row_blocks, axis=0), jnp.tile(b1, 4).reshape(4 * cmid, 1)


def _build_layer2_weight(w2, b2):
    """Pack (Cmid, Cout, 3, 3) deconv weight into one (16*Cout, 16*Cmid) slab.

    Rows   : (ry, sy, rx, sx, co) -- sub-position within each 4x4 output block.
    Columns: g=(gy,gx) major, then (py, px, cm) -- which coarse-shifted copy
             of `mid` (and which layer-1 phase) contributes.
    """
    cmid, cout = w2.shape[0], w2.shape[1]
    mats = []
    for gy in (0, 1):
        for gx in (0, 1):
            rows = []
            for ry in (0, 1):
                for sy in (0, 1):
                    for rx in (0, 1):
                        for sx in (0, 1):
                            cols = []
                            for py in (0, 1):
                                for px in (0, 1):
                                    ey = 2 * gy + py - ry
                                    ex = 2 * gx + px - rx
                                    ky = _TAP.get((sy, ey)) if ey in (0, 1) else None
                                    kx = _TAP.get((sx, ex)) if ex in (0, 1) else None
                                    if ky is None or kx is None:
                                        cols.append(jnp.zeros((cout, cmid), w2.dtype))
                                    else:
                                        cols.append(w2[:, :, ky, kx].T)
                            rows.append(jnp.concatenate(cols, axis=1))
            mats.append(jnp.concatenate(rows, axis=0))
    w2all = jnp.concatenate(mats, axis=1)          # (16*Cout, 16*Cmid)
    return w2all, jnp.tile(b2, 16).reshape(16 * cout, 1)


def pack_params(params):
    """Pack deconv weights once at param-load time (NOT inside the jitted fwd)."""
    w1m, b1c = _build_layer1_weight(params["w1"], params["b1"])
    w2m, b2c = _build_layer2_weight(params["w2"], params["b2"])
    return {"w1m": w1m, "b1c": b1c, "w2m": w2m, "b2c": b2c}


def init_params(key):
    k1, k2, k3, k4 = jax.random.split(key, 4)
    # ConvTranspose2d weight layout: (in_channels, out_channels, kH, kW)
    return {
        "w1": jax.random.normal(k1, (8, 16, 3, 3), jnp.float32) * 0.1,
        "b1": jax.random.normal(k2, (16,), jnp.float32) * 0.1,
        "w2": jax.random.normal(k3, (16, 3, 3, 3), jnp.float32) * 0.1,
        "b2": jax.random.normal(k4, (3,), jnp.float32) * 0.1,
    }


# ---------------------------------------------------------------------------
# Jitted forward: tiny layout plumbing + one pallas_call.
# ---------------------------------------------------------------------------
@jax.jit
def color_decoder_forward(x_nchw, packed):
    n, cin, h, w = x_nchw.shape
    q = h * w
    lanes = n * q
    w1m, b1c = packed["w1m"], packed["b1c"]
    w2m, b2c = packed["w2m"], packed["b2c"]
    r1, k1 = w1m.shape
    r2, k2 = w2m.shape
    cmid = r1 // 4
    cout = r2 // 16

    # Input with batch folded into lanes: (Cin, N*H*W), lane = n*Q + y*W + x.
    x_flat = jnp.transpose(x_nchw, (1, 0, 2, 3)).reshape(cin, lanes)

    # Boundary masks for the coarse shifts g=(gy,gx); constant-folded by XLA.
    yy = jax.lax.broadcasted_iota(jnp.int32, (h, w), 0)
    xx = jax.lax.broadcasted_iota(jnp.int32, (h, w), 1)
    masks = []
    for gy in (0, 1):
        for gx in (0, 1):
            m = ((yy + gy < h) & (xx + gx < w)).astype(jnp.float32).reshape(1, q)
            masks.append(jnp.tile(m, (1, n)))              # same pattern per batch
    mask = jnp.stack(masks, axis=0).reshape(4, 1, lanes)

    kernel = functools.partial(
        _fused_decoder_kernel, deltas=(0, 1, w, w + 1), lanes=lanes)

    flops = 2 * lanes * (r1 * k1 + r2 * k2)
    transcendentals = 2 * r2 * lanes                       # sigmoid ~ exp + recip
    bytes_accessed = 4 * (cin * lanes + w1m.size + b1c.size + w2m.size
                          + b2c.size + mask.size + r2 * lanes)

    out_sub = pl.pallas_call(
        kernel,
        out_shape=jax.ShapeDtypeStruct((r2, lanes), jnp.float32),
        in_specs=[
            pl.BlockSpec(memory_space=pltpu.MemorySpace.VMEM),   # x_flat
            pl.BlockSpec(memory_space=pltpu.MemorySpace.VMEM),   # w1m
            pl.BlockSpec(memory_space=pltpu.MemorySpace.VMEM),   # b1c
            pl.BlockSpec(memory_space=pltpu.MemorySpace.VMEM),   # w2m
            pl.BlockSpec(memory_space=pltpu.MemorySpace.VMEM),   # b2c
            pl.BlockSpec(memory_space=pltpu.MemorySpace.VMEM),   # mask
        ],
        out_specs=pl.BlockSpec(memory_space=pltpu.MemorySpace.VMEM),
        cost_estimate=pl.CostEstimate(
            flops=int(flops),
            transcendentals=int(transcendentals),
            bytes_accessed=int(bytes_accessed)),
    )(x_flat, w1m, b1c, w2m, b2c, mask)

    # Sub-pixel reassembly (tiny, pure XLA): rows are (ry, sy, rx, sx, co),
    # lanes are (n, qy, qx). Output pixel (4qy+2ry+sy, 4qx+2rx+sx).
    o = out_sub.reshape(2, 2, 2, 2, cout, n, h, w)
    o = jnp.transpose(o, (5, 4, 6, 0, 1, 7, 2, 3))  # (n, co, qy, ry, sy, qx, rx, sx)
    return o.reshape(n, cout, 4 * h, 4 * w)


# ---------------------------------------------------------------------------
# Pure-JAX reference (zero-upsample formulation) for a correctness check.
# ---------------------------------------------------------------------------
def _reference_forward(x, params):
    def deconv(inp, wgt, bias):
        w_flip = jnp.transpose(wgt, (1, 0, 2, 3))[:, :, ::-1, ::-1]
        y = jax.lax.conv_general_dilated(
            inp, w_flip, window_strides=(1, 1), padding=((1, 2), (1, 2)),
            lhs_dilation=(2, 2), dimension_numbers=("NCHW", "OIHW", "NCHW"),
            precision=jax.lax.Precision.HIGHEST)
        return y + bias.reshape(1, -1, 1, 1)

    hid = jax.nn.relu(deconv(x, params["w1"], params["b1"]))
    return jax.nn.sigmoid(deconv(hid, params["w2"], params["b2"]))


if __name__ == "__main__":
    key = jax.random.PRNGKey(0)
    kx, kp = jax.random.split(key)
    # NCHW input like the PyTorch module: batch=2, in_channels=8, spatial 8x8
    x = jax.random.normal(kx, (2, 8, 8, 8), jnp.float32)
    params = init_params(kp)
    packed = pack_params(params)           # one-time packing, outside the fwd

    out = color_decoder_forward(x, packed)
    jax.block_until_ready(out)

    assert out.shape == (2, 3, 32, 32), out.shape
    assert out.dtype == jnp.float32

    ref = _reference_forward(x, params)
    max_err = float(jnp.max(jnp.abs(out - ref)))
    assert max_err < 5e-3, f"max abs error vs reference: {max_err}"
    assert bool(jnp.all((out >= 0.0) & (out <= 1.0)))
    print("KERNEL_OK")
</pallas_src>

<mosaic_0001>
module attributes {stable_mosaic.version = 11 : i64} {
  func.func @_fused_decoder_kernel(%arg0: memref<8x128xf32, #tpu.memory_space<vmem>>, %arg1: memref<64x32xf32, #tpu.memory_space<vmem>>, %arg2: memref<64x1xf32, #tpu.memory_space<vmem>>, %arg3: memref<48x256xf32, #tpu.memory_space<vmem>>, %arg4: memref<48x1xf32, #tpu.memory_space<vmem>>, %arg5: memref<4x1x128xf32, #tpu.memory_space<vmem>>, %arg6: memref<48x128xf32, #tpu.memory_space<vmem>>) attributes {dimension_semantics = [], scalar_prefetch = 0 : i64, scratch_operands = 0 : i64, tpu.core_type = #tpu.core_type<tc>} {
    %c0 = arith.constant 0 : index
    %c0_0 = arith.constant 0 : index
    %0 = vector.load %arg0[%c0, %c0_0] : memref<8x128xf32, #tpu.memory_space<vmem>>, vector<8x128xf32>
    %c127_i32 = arith.constant 127 : i32
    %1 = tpu.dynamic_rotate %0 by %c127_i32 dim 1 : vector<8x128xf32>, i32 -> vector<8x128xf32>
    %c1 = arith.constant 1 : index
    %c0_1 = arith.constant 0 : index
    %c0_2 = arith.constant 0 : index
    %2 = vector.load %arg5[%c1, %c0_1, %c0_2] : memref<4x1x128xf32, #tpu.memory_space<vmem>>, vector<1x1x128xf32>
    %3 = vector.shape_cast %2 : vector<1x1x128xf32> to vector<1x128xf32>
    %4 = vector.broadcast %3 : vector<1x128xf32> to vector<8x128xf32>
    %5 = arith.mulf %1, %4 : vector<8x128xf32>
    %c120_i32 = arith.constant 120 : i32
    %6 = tpu.dynamic_rotate %0 by %c120_i32 dim 1 : vector<8x128xf32>, i32 -> vector<8x128xf32>
    %c2 = arith.constant 2 : index
    %c0_3 = arith.constant 0 : index
    %c0_4 = arith.constant 0 : index
    %7 = vector.load %arg5[%c2, %c0_3, %c0_4] : memref<4x1x128xf32, #tpu.memory_space<vmem>>, vector<1x1x128xf32>
    %8 = vector.shape_cast %7 : vector<1x1x128xf32> to vector<1x128xf32>
    %9 = vector.broadcast %8 : vector<1x128xf32> to vector<8x128xf32>
    %10 = arith.mulf %6, %9 : vector<8x128xf32>
    %c119_i32 = arith.constant 119 : i32
    %11 = tpu.dynamic_rotate %0 by %c119_i32 dim 1 : vector<8x128xf32>, i32 -> vector<8x128xf32>
    %c3 = arith.constant 3 : index
    %c0_5 = arith.constant 0 : index
    %c0_6 = arith.constant 0 : index
    %12 = vector.load %arg5[%c3, %c0_5, %c0_6] : memref<4x1x128xf32, #tpu.memory_space<vmem>>, vector<1x1x128xf32>
    %13 = vector.shape_cast %12 : vector<1x1x128xf32> to vector<1x128xf32>
    %14 = vector.broadcast %13 : vector<1x128xf32> to vector<8x128xf32>
    %15 = arith.mulf %11, %14 : vector<8x128xf32>
    %16 = tpu.concatenate %0, %5, %10, %15 in 0 : vector<8x128xf32>, vector<8x128xf32>, vector<8x128xf32>, vector<8x128xf32> -> vector<32x128xf32>
    %c0_7 = arith.constant 0 : index
    %c0_8 = arith.constant 0 : index
    %17 = vector.load %arg1[%c0_7, %c0_8] : memref<64x32xf32, #tpu.memory_space<vmem>>, vector<64x32xf32>
    %cst = arith.constant dense<0.000000e+00> : vector<64x128xf32>
    %18 = tpu.matmul %17, %16, %cst {dimension_numbers = #tpu.dot_dimension_numbers<[1], [0], [0], [1], [0, 0, 1, 1], [], []>} : vector<64x32xf32>, vector<32x128xf32>, vector<64x128xf32> -> vector<64x128xf32>
    %c0_9 = arith.constant 0 : index
    %c0_10 = arith.constant 0 : index
    %19 = vector.load %arg2[%c0_9, %c0_10] : memref<64x1xf32, #tpu.memory_space<vmem>>, vector<64x1xf32>
    %20 = vector.broadcast %19 : vector<64x1xf32> to vector<64x128xf32>
    %21 = arith.addf %18, %20 : vector<64x128xf32>
    %cst_11 = arith.constant 0.000000e+00 : f32
    %22 = vector.broadcast %cst_11 : f32 to vector<64x128xf32>
    %23 = arith.maximumf %21, %22 : vector<64x128xf32>
    %c127_i32_12 = arith.constant 127 : i32
    %24 = tpu.dynamic_rotate %23 by %c127_i32_12 dim 1 : vector<64x128xf32>, i32 -> vector<64x128xf32>
    %c1_13 = arith.constant 1 : index
    %c0_14 = arith.constant 0 : index
    %c0_15 = arith.constant 0 : index
    %25 = vector.load %arg5[%c1_13, %c0_14, %c0_15] : memref<4x1x128xf32, #tpu.memory_space<vmem>>, vector<1x1x128xf32>
    %26 = vector.shape_cast %25 : vector<1x1x128xf32> to vector<1x128xf32>
    %27 = vector.broadcast %26 : vector<1x128xf32> to vector<64x128xf32>
    %28 = arith.mulf %24, %27 : vector<64x128xf32>
    %c120_i32_16 = arith.constant 120 : i32
    %29 = tpu.dynamic_rotate %23 by %c120_i32_16 dim 1 : vector<64x128xf32>, i32 -> vector<64x128xf32>
    %c2_17 = arith.constant 2 : index
    %c0_18 = arith.constant 0 : index
    %c0_19 = arith.constant 0 : index
    %30 = vector.load %arg5[%c2_17, %c0_18, %c0_19] : memref<4x1x128xf32, #tpu.memory_space<vmem>>, vector<1x1x128xf32>
    %31 = vector.shape_cast %30 : vector<1x1x128xf32> to vector<1x128xf32>
    %32 = vector.broadcast %31 : vector<1x128xf32> to vector<64x128xf32>
    %33 = arith.mulf %29, %32 : vector<64x128xf32>
    %c119_i32_20 = arith.constant 119 : i32
    %34 = tpu.dynamic_rotate %23 by %c119_i32_20 dim 1 : vector<64x128xf32>, i32 -> vector<64x128xf32>
    %c3_21 = arith.constant 3 : index
    %c0_22 = arith.constant 0 : index
    %c0_23 = arith.constant 0 : index
    %35 = vector.load %arg5[%c3_21, %c0_22, %c0_23] : memref<4x1x128xf32, #tpu.memory_space<vmem>>, vector<1x1x128xf32>
    %36 = vector.shape_cast %35 : vector<1x1x128xf32> to vector<1x128xf32>
    %37 = vector.broadcast %36 : vector<1x128xf32> to vector<64x128xf32>
    %38 = arith.mulf %34, %37 : vector<64x128xf32>
    %39 = tpu.concatenate %23, %28, %33, %38 in 0 : vector<64x128xf32>, vector<64x128xf32>, vector<64x128xf32>, vector<64x128xf32> -> vector<256x128xf32>
    %c0_24 = arith.constant 0 : index
    %c0_25 = arith.constant 0 : index
    %40 = vector.load %arg3[%c0_24, %c0_25] : memref<48x256xf32, #tpu.memory_space<vmem>>, vector<48x256xf32>
    %cst_26 = arith.constant dense<0.000000e+00> : vector<48x128xf32>
    %41 = tpu.matmul %40, %39, %cst_26 {dimension_numbers = #tpu.dot_dimension_numbers<[1], [0], [0], [1], [0, 0, 1, 1], [], []>} : vector<48x256xf32>, vector<256x128xf32>, vector<48x128xf32> -> vector<48x128xf32>
    %c0_27 = arith.constant 0 : index
    %c0_28 = arith.constant 0 : index
    %42 = vector.load %arg4[%c0_27, %c0_28] : memref<48x1xf32, #tpu.memory_space<vmem>>, vector<48x1xf32>
    %43 = vector.broadcast %42 : vector<48x1xf32> to vector<48x128xf32>
    %44 = arith.addf %41, %43 : vector<48x128xf32>
    %45 = arith.negf %44 : vector<48x128xf32>
    %46 = math.exp %45 : vector<48x128xf32>
    %cst_29 = arith.constant 1.000000e+00 : f32
    %47 = vector.broadcast %cst_29 : f32 to vector<48x128xf32>
    %48 = arith.addf %47, %46 : vector<48x128xf32>
    %49 = arith.divf %47, %48 : vector<48x128xf32>
    %c0_30 = arith.constant 0 : index
    %c0_31 = arith.constant 0 : index
    %50 = vector.load %arg6[%c0_30, %c0_31] : memref<48x128xf32, #tpu.memory_space<vmem>>, vector<48x128xf32>
    tpu.vector_store %arg6[%c0_30, %c0_31], %49 {strides = array<i32>} : memref<48x128xf32, #tpu.memory_space<vmem>>, vector<48x128xf32>,
    return
  }
}

</mosaic_0001>

<bundles_post_ra>
// kernel: color_decoder_forward.1
= control target key start
LH: loop header
LB: loop body
LE: loop exit
PB: predicated region body
PF: predicated region fallthrough
CT: control target
= control target key end

     0   :  { %11 = vsyncpa [#allocation3], 0  ;;  %s742_s21 = smov [#allocation2]   ;;  %s976_s0 = inlined_call_operand.vmem [shape: f32[8,128], index: 0, kind: input, shape index: {}]   ;;  %s977_s1 = inlined_call_operand.vmem [shape: f32[64,32], index: 1, kind: input, shape index: {}]   ;;  %s978_s2 = inlined_call_operand.vmem [shape: f32[64,1], index: 2, kind: input, shape index: {}]   ;;  %s979_s3 = inlined_call_operand.hbm [shape: f32[48,256], index: 3, kind: input, shape index: {}]   ;;  %s980_s4 = inlined_call_operand.vmem [shape: f32[48,1], index: 4, kind: input, shape index: {}]   ;;  %s981_s5 = inlined_call_operand.vmem [shape: f32[4,1,128], index: 5, kind: input, shape index: {}]   ;;  %s982_s6 = inlined_call_operand.vmem [shape: f32[48,128], index: 6, kind: output, shape index: {}]  }
   0x1   :  { %s23_s22 = sshll.u32 %s742_s21, 4  ;;  %s718_s25 = scalar_lea.hbm %s979_s3, 1536  ;;  %s24_s22 = int_to_ptr.vmem [resolvable:$true] %s23_s22 }
   0x2   :  { %p719_p0 = scmp.ne.s32.totalorder %s979_s3, %s718_s25  ;;  %p722_p1 = scmp.lt.u32.totalorder %s718_s25, %s979_s3 }
   0x4   :  { %p724_p2 = pnand %p722_p1, %p719_p0 }
   0x6   :  { %727 = shalt.err (!%p724_p2)
}
   0x7   :  { %s728_s30 = scalar_lea.vmem %s24_s22, 1536  ;;  %p733_p4 = scmp.lt.s32.totalorder %s24_s22, %s24_s22 }
   0x8   :  { %p729_p3 = scmp.ne.s32.totalorder %s24_s22, %s728_s30  ;;  %p734_p5 = scmp.lt.s32.totalorder %s728_s30, %s728_s30 }
   0xa   :  { %p735_p6 = por %p734_p5, %p733_p4 }
   0xc   :  { %p736_p7 = pnand %p735_p6, %p729_p3 }
   0xe   :  { %739 = shalt.err (!%p736_p7)
}
   0xf   :  { %s743_s7 = smov 256   ;;  %s744_s8 = smov 16  }
  0x10   :  { %29 = dma.hbm_to_vmem [thread:$0]  %s979_s3, 1536, %s24_s22, [#allocation3], %s743_s7, %s743_s7, %s744_s8  }
  0x11   :  { %740 = dma.done.wait [#allocation3], 1536  }
  0x12   :  { %741 = vsyncadd [#allocation3], 4294965760  ;;  %vm127_vm0 = vcmask 261120   ;;  %v37_v0 = vld [vmem:[%s976_s0] sm:$0xff]  ;;  %s745_s13 = smov 127   ;;  %s746_s14 = smov 119  }
  0x13   :  { %38 = vrot.lane.b32.xlu0 %v37_v0, %s745_s13  ;;  %60 = vrot.lane.b32.xlu1 %v37_v0, %s746_s14  ;;  %v71_v1 = vld [vmem:[%s977_s1] sm:$0xff]  ;;  %s747_s3 = smov 120   ;;  %v748_v3 = vmov 0   ;;  %v80_v4 = vld [vmem:[%s978_s2 + $0x8] sm:$0xff] }
  0x14   :  { %617 = vmatprep.mubr.msk.f32.mxu0 %vm127_vm0, %v71_v1  ;;  %v79_v2 = vld [vmem:[%s978_s2] sm:$0xff]  ;;  %692 = vset.pattern.permute.xlu1 %v748_v3  ;;  %v81_v5 = vld [vmem:[%s978_s2 + $0x10] sm:$0xff]  ;;  %v82_v7 = vld [vmem:[%s978_s2 + $0x18] sm:$0xff] }
  0x15   :  { %693 = vset.pattern.permute.xlu0 %v748_v3  ;;  %v83_v6 = vld [vmem:[%s978_s2 + $0x20] sm:$0xff]  ;;  %v85_v8 = vld [vmem:[%s978_s2 + $0x30] sm:$0xff]  ;;  %v84_v9 = vld [vmem:[%s978_s2 + $0x28] sm:$0xff] }
  0x16   :  { %v86_v10 = vld [vmem:[%s978_s2 + $0x38] sm:$0xff]  ;;  %v833_v11 = vld [vmem:[%s981_s5 + $0x1] ss:$0 sm:$0xff]  ;;  %v838_v13 = vld [vmem:[%s981_s5 + $0x3] ss:$0 sm:$0xff] }
  0x17   :  { %49 = vrot.lane.b32.xlu0 %v37_v0, %s747_s3  ;;  %89 = vperm.xlu1 %692, %v79_v2   ;;  %v844_v16 = vld [vmem:[%s981_s5 + $0x2] ss:$0 sm:$0xff]  ;;  %v72_v22 = vld [vmem:[%s977_s1 + $0x8] sm:$0xff]  ;;  %v73_v23 = vld [vmem:[%s977_s1 + $0x10] sm:$0xff] }
  0x18   :  { %v74_v24 = vld [vmem:[%s977_s1 + $0x18] sm:$0xff]  ;;  %v75_v25 = vld [vmem:[%s977_s1 + $0x20] sm:$0xff]  ;;  %v76_v26 = vld [vmem:[%s977_s1 + $0x28] sm:$0xff] }
  0x19   :  { %v77_v27 = vld [vmem:[%s977_s1 + $0x30] sm:$0xff]  ;;  %v78_v28 = vld [vmem:[%s977_s1 + $0x38] sm:$0xff]  ;;  %v338_v1 = vld [vmem:[#allocation2 + $0x8] sm:$0xff] }
  0x1a   :  { %v342_v2 = vld [vmem:[#allocation2 + $0x28] sm:$0xff] }
  0x1b   :  { %94 = vperm.xlu0 %693, %v80_v4   ;;  %99 = vperm.xlu1 %692, %v81_v5   ;;  %v350_v3 = vld [vmem:[%s980_s4 + $0x8] sm:$0xff]  ;;  %v349_v4 = vld [vmem:[%s980_s4] sm:$0xff]  ;;  %v352_v5 = vld [vmem:[%s980_s4 + $0x18] sm:$0xff] }
  0x1c   :  { %459 = vmatprep.mubr.f32.mxu1 %v342_v2 }
  0x1f   :  { %109 = vperm.xlu0 %693, %v83_v6   ;;  %104 = vperm.xlu1 %692, %v82_v7   ;;  %v351_v6 = vld [vmem:[%s980_s4 + $0x10] sm:$0xff]  ;;  %v354_v7 = vld [vmem:[%s980_s4 + $0x28] sm:$0xff] }
  0x23   :  { %119 = vperm.xlu0 %693, %v85_v8   ;;  %114 = vperm.xlu1 %692, %v84_v9   ;;  %v353_v8 = vld [vmem:[%s980_s4 + $0x20] sm:$0xff] }
  0x27   :  { %124 = vperm.xlu1 %692, %v86_v10  }
  0x85   :  { %v39_v12 = vpop.permute.xlu0 %38  ;;  %v61_v14 = vpop.permute.xlu1 %60 }
  0x86   :  { %v48_v15 = vmul.f32 %v833_v11, %v39_v12  ;;  %v70_v17 = vmul.f32 %v838_v13, %v61_v14 }
  0x88   :  { %v629_v18 = vpack.c.bf16 %v48_v15, %v37_v0 }
  0x89   :  { %v50_v19 = vpop.permute.xlu0 %49 }
  0x8a   :  { %v59_v20 = vmul.f32 %v844_v16, %v50_v19  ;;  %630 = vmatprep.subr.bf16.mxu0 %v629_v18 }
  0x8b   :  { %632 = vmatpush3.bf16.msra.mxu0 %v629_v18 }
  0x8c   :  { %v633_v21 = vpack.c.bf16 %v70_v17, %v59_v20 }
  0x8e   :  { %634 = vmatprep.subr.bf16.mxu0 %v633_v21 }
  0x8f   :  { %636 = vmatpush3.bf16.msra.mxu0 %v633_v21 }
  0x92   :  { %618 = vmatmul.mubr.msk.f32.vlgmr.msra.gmra.mrb[0].mxu0 %vm127_vm0, %v72_v22 }
  0x93   :  { %620 = vmatprep.mubr.msk.f32.mxu0 %vm127_vm0, %v73_v23 }
  0x96   :  { %621 = vmatmul.mubr.msk.f32.gmra.mrb[2].mxu0 %vm127_vm0, %v74_v24  ;;  %v90_v29 = vpop.permute.xlu1 %89 }
  0x97   :  { %623 = vmatprep.mubr.msk.f32.mxu0 %vm127_vm0, %v75_v25 }
  0x9a   :  { %624 = vmatmul.mubr.msk.f32.gmra.mrb[4].mxu0 %vm127_vm0, %v76_v26  ;;  %v100_v30 = vpop.permute.xlu1 %99  ;;  %v95_v31 = vpop.permute.xlu0 %94 }
  0x9b   :  { %626 = vmatprep.mubr.msk.f32.mxu0 %vm127_vm0, %v77_v27 }
  0x9e   :  { %627 = vmatmul.mubr.msk.f32.gmra.mrb[6].mxu0 %vm127_vm0, %v78_v28  ;;  %v105_v32 = vpop.permute.xlu1 %104  ;;  %v110_v45 = vpop.permute.xlu0 %109 }
  0x9f   :  { %449 = vmatprep.mubr.f32.mxu0 %v338_v1 }
  0xa2   :  { %v115_v42 = vpop.permute.xlu1 %114  ;;  %v120_v57 = vpop.permute.xlu0 %119 }
  0xa6   :  { %v125_v54 = vpop.permute.xlu1 %124 }
 0x165   :  { %v619_v33 = vpop.f32.mrb[0].mxu0 }
 0x166   :  { %v224_v34 = vadd.f32 %v619_v33, %v95_v31  ;;  %v218_v35 = vpop.f32.mrb[1].mxu0 }
 0x167   :  { %v219_v36 = vadd.f32 %v218_v35, %v90_v29 }
 0x168   :  { %v258_v37 = vmax.f32 %v224_v34, 0.0 }
 0x169   :  { %v257_v38 = vmax.f32 %v219_v36, 0.0  ;;  %v622_v39 = vpop.f32.mrb[2].mxu0 }
 0x16a   :  { %v234_v40 = vadd.f32 %v622_v39, %v105_v32  ;;  %v228_v41 = vpop.f32.mrb[3].mxu0  ;;  %291 = vrot.lane.b32.xlu1 %v258_v37, %s747_s3 }
 0x16b   :  { %v229_v43 = vadd.f32 %v228_v41, %v100_v30  ;;  %289 = vrot.lane.b32.xlu0 %v257_v38, %s747_s3  ;;  %v878_v44 = vpack.c.bf16 %v258_v37, %v257_v38 }
 0x16c   :  { %v260_v46 = vmax.f32 %v234_v40, 0.0 }
 0x16d   :  { %v259_v47 = vmax.f32 %v229_v43, 0.0  ;;  %v625_v48 = vpop.f32.mrb[4].mxu0 }
 0x16e   :  { %v244_v49 = vadd.f32 %v625_v48, %v115_v42  ;;  %v238_v50 = vpop.f32.mrb[5].mxu0  ;;  %315 = vrot.lane.b32.xlu1 %v258_v37, %s746_s14 }
 0x16f   :  { %v239_v51 = vadd.f32 %v238_v50, %v110_v45  ;;  %313 = vrot.lane.b32.xlu0 %v257_v38, %s746_s14  ;;  %v882_v52 = vpack.c.bf16 %v260_v46, %v259_v47 }
 0x170   :  { %v262_v53 = vmax.f32 %v244_v49, 0.0 }
 0x171   :  { %v261_v55 = vmax.f32 %v239_v51, 0.0  ;;  %v628_v56 = vpop.f32.mrb[6].mxu0 }
 0x172   :  { %v254_v58 = vadd.f32 %v628_v56, %v125_v54  ;;  %v248_v59 = vpop.f32.mrb[7].mxu0  ;;  %267 = vrot.lane.b32.xlu1 %v258_v37, %s745_s13 }
 0x173   :  { %v249_v60 = vadd.f32 %v248_v59, %v120_v57  ;;  %265 = vrot.lane.b32.xlu0 %v257_v38, %s745_s13  ;;  %v886_v61 = vpack.c.bf16 %v262_v53, %v261_v55 }
 0x174   :  { %v264_v62 = vmax.f32 %v254_v58, 0.0 }
 0x175   :  { %v263_v63 = vmax.f32 %v249_v60, 0.0 }
 0x176   :  { %295 = vrot.lane.b32.xlu1 %v260_v46, %s747_s3 }
 0x177   :  { %293 = vrot.lane.b32.xlu0 %v259_v47, %s747_s3  ;;  %v890_v0 = vpack.c.bf16 %v264_v62, %v263_v63 }
 0x17a   :  { %319 = vrot.lane.b32.xlu1 %v260_v46, %s746_s14 }
 0x17b   :  { %317 = vrot.lane.b32.xlu0 %v259_v47, %s746_s14 }
 0x17e   :  { %299 = vrot.lane.b32.xlu1 %v262_v53, %s747_s3 }
 0x17f   :  { %297 = vrot.lane.b32.xlu0 %v261_v55, %s747_s3 }
 0x182   :  { %303 = vrot.lane.b32.xlu1 %v264_v62, %s747_s3 }
 0x183   :  { %301 = vrot.lane.b32.xlu0 %v263_v63, %s747_s3 }
 0x186   :  { %271 = vrot.lane.b32.xlu1 %v260_v46, %s745_s13 }
 0x187   :  { %269 = vrot.lane.b32.xlu0 %v259_v47, %s745_s13 }
 0x18a   :  { %323 = vrot.lane.b32.xlu1 %v262_v53, %s746_s14 }
 0x18b   :  { %321 = vrot.lane.b32.xlu0 %v261_v55, %s746_s14 }
 0x18e   :  { %275 = vrot.lane.b32.xlu1 %v262_v53, %s745_s13 }
 0x18f   :  { %273 = vrot.lane.b32.xlu0 %v261_v55, %s745_s13 }
 0x192   :  { %327 = vrot.lane.b32.xlu1 %v264_v62, %s746_s14 }
 0x193   :  { %325 = vrot.lane.b32.xlu0 %v263_v63, %s746_s14 }
 0x196   :  { %279 = vrot.lane.b32.xlu1 %v264_v62, %s745_s13 }
 0x197   :  { %277 = vrot.lane.b32.xlu0 %v263_v63, %s745_s13 }
 0x19a   :  { %362 = vperm.xlu1 %692, %v350_v3  }
 0x19b   :  { %357 = vperm.xlu0 %693, %v349_v4  }
 0x19e   :  { %372 = vperm.xlu1 %692, %v352_v5  }
 0x19f   :  { %367 = vperm.xlu0 %693, %v351_v6  }
 0x1a2   :  { %382 = vperm.xlu1 %692, %v354_v7   ;;  %v337_v7 = vld [vmem:[#allocation2] sm:$0xff] }
 0x1a3   :  { %377 = vperm.xlu0 %693, %v353_v8   ;;  %v341_v8 = vld [vmem:[#allocation2 + $0x20] sm:$0xff] }
 0x1dc   :  { %v292_v9 = vpop.permute.xlu1 %291 }
 0x1dd   :  { %v306_v10 = vmul.f32 %v844_v16, %v292_v9  ;;  %v290_v12 = vpop.permute.xlu0 %289  ;;  %v340_v9 = vld [vmem:[#allocation2 + $0x18] sm:$0xff] }
 0x1de   :  { %v305_v14 = vmul.f32 %v844_v16, %v290_v12  ;;  %v343_v12 = vld [vmem:[#allocation2 + $0x30] sm:$0xff] }
 0x1e0   :  { %v637_v15 = vpack.c.bf16 %v306_v10, %v305_v14  ;;  %v316_v17 = vpop.permute.xlu1 %315  ;;  %v344_v10 = vld [vmem:[#allocation2 + $0x38] sm:$0xff]  ;;  %v346_v14 = vld [vmem:[#allocation2 + $0x48] sm:$0xff] }
 0x1e1   :  { %v314_v18 = vpop.permute.xlu0 %313  ;;  %v330_v36 = vmul.f32 %v838_v13, %v316_v17  ;;  %v347_v17 = vld [vmem:[#allocation2 + $0x50] sm:$0xff] }
 0x1e2   :  { %638 = vmatprep.subr.bf16.mxu0 %v637_v15  ;;  %669 = vmatprep.subr.bf16.mxu1 %v637_v15  ;;  %v329_v37 = vmul.f32 %v838_v13, %v314_v18  ;;  %v348_v15 = vld [vmem:[#allocation2 + $0x58] sm:$0xff] }
 0x1e3   :  { %640 = vmatpush3.bf16.msra.mxu0 %v878_v44  ;;  %677 = vmatpush3.bf16.msra.mxu1 %v878_v44 }
 0x1e4   :  { %v268_v19 = vpop.permute.xlu1 %267  ;;  %v653_v44 = vpack.c.bf16 %v330_v36, %v329_v37 }
 0x1e5   :  { %v266_v20 = vpop.permute.xlu0 %265  ;;  %v282_v41 = vmul.f32 %v833_v11, %v268_v19 }
 0x1e6   :  { %v281_v42 = vmul.f32 %v833_v11, %v266_v20 }
 0x1e8   :  { %v296_v21 = vpop.permute.xlu1 %295  ;;  %v655_v47 = vpack.c.bf16 %v282_v41, %v281_v42 }
 0x1e9   :  { %v308_v22 = vmul.f32 %v844_v16, %v296_v21  ;;  %v294_v23 = vpop.permute.xlu0 %293 }
 0x1ea   :  { %v307_v24 = vmul.f32 %v844_v16, %v294_v23 }
 0x1ec   :  { %v641_v25 = vpack.c.bf16 %v308_v22, %v307_v24  ;;  %v320_v26 = vpop.permute.xlu1 %319 }
 0x1ed   :  { %v318_v27 = vpop.permute.xlu0 %317  ;;  %v332_v45 = vmul.f32 %v838_v13, %v320_v26 }
 0x1ee   :  { %642 = vmatprep.subr.bf16.mxu0 %v641_v25  ;;  %670 = vmatprep.subr.bf16.mxu1 %v641_v25  ;;  %v331_v46 = vmul.f32 %v838_v13, %v318_v27 }
 0x1ef   :  { %644 = vmatpush3.bf16.msra.mxu0 %v882_v52  ;;  %678 = vmatpush3.bf16.msra.mxu1 %v882_v52 }
 0x1f0   :  { %v300_v28 = vpop.permute.xlu1 %299  ;;  %v657_v51 = vpack.c.bf16 %v332_v45, %v331_v46 }
 0x1f1   :  { %v310_v29 = vmul.f32 %v844_v16, %v300_v28  ;;  %v298_v30 = vpop.permute.xlu0 %297 }
 0x1f2   :  { %v309_v31 = vmul.f32 %v844_v16, %v298_v30 }
 0x1f4   :  { %v645_v32 = vpack.c.bf16 %v310_v29, %v309_v31  ;;  %v304_v33 = vpop.permute.xlu1 %303 }
 0x1f5   :  { %v312_v34 = vmul.f32 %v844_v16, %v304_v33  ;;  %v302_v35 = vpop.permute.xlu0 %301 }
 0x1f6   :  { %v311_v38 = vmul.f32 %v844_v16, %v302_v35  ;;  %646 = vmatprep.subr.bf16.mxu0 %v645_v32  ;;  %671 = vmatprep.subr.bf16.mxu1 %v645_v32 }
 0x1f7   :  { %648 = vmatpush3.bf16.msra.mxu0 %v886_v61  ;;  %679 = vmatpush3.bf16.msra.mxu1 %v886_v61 }
 0x1f8   :  { %v649_v39 = vpack.c.bf16 %v312_v34, %v311_v38  ;;  %v272_v40 = vpop.permute.xlu1 %271 }
 0x1f9   :  { %v270_v43 = vpop.permute.xlu0 %269  ;;  %v284_v48 = vmul.f32 %v833_v11, %v272_v40 }
 0x1fa   :  { %650 = vmatprep.subr.bf16.mxu0 %v649_v39  ;;  %672 = vmatprep.subr.bf16.mxu1 %v649_v39  ;;  %v283_v49 = vmul.f32 %v833_v11, %v270_v43 }
 0x1fb   :  { %652 = vmatpush3.bf16.msra.mxu0 %v890_v0  ;;  %680 = vmatpush3.bf16.msra.mxu1 %v890_v0 }
 0x1fc   :  { %v324_v16 = vpop.permute.xlu1 %323  ;;  %654 = vmatprep.subr.bf16.mxu0 %v653_v44  ;;  %673 = vmatprep.subr.bf16.mxu1 %v653_v44  ;;  %v659_v55 = vpack.c.bf16 %v284_v48, %v283_v49 }
 0x1fd   :  { %v322_v50 = vpop.permute.xlu0 %321  ;;  %v334_v52 = vmul.f32 %v838_v13, %v324_v16 }
 0x1fe   :  { %v333_v53 = vmul.f32 %v838_v13, %v322_v50 }
 0x1ff   :  { %656 = vmatpush3.bf16.msra.mxu0 %v655_v47  ;;  %681 = vmatpush3.bf16.msra.mxu1 %v655_v47 }
 0x200   :  { %v276_v54 = vpop.permute.xlu1 %275  ;;  %658 = vmatprep.subr.bf16.mxu0 %v657_v51  ;;  %674 = vmatprep.subr.bf16.mxu1 %v657_v51  ;;  %v661_v58 = vpack.c.bf16 %v334_v52, %v333_v53 }
 0x201   :  { %v286_v56 = vmul.f32 %v833_v11, %v276_v54  ;;  %v274_v57 = vpop.permute.xlu0 %273 }
 0x202   :  { %v285_v59 = vmul.f32 %v833_v11, %v274_v57 }
 0x203   :  { %660 = vmatpush3.bf16.msra.mxu0 %v659_v55  ;;  %682 = vmatpush3.bf16.msra.mxu1 %v659_v55 }
 0x204   :  { %v663_v60 = vpack.c.bf16 %v286_v56, %v285_v59  ;;  %v328_v61 = vpop.permute.xlu1 %327  ;;  %662 = vmatprep.subr.bf16.mxu0 %v661_v58  ;;  %675 = vmatprep.subr.bf16.mxu1 %v661_v58 }
 0x205   :  { %v336_v62 = vmul.f32 %v838_v13, %v328_v61  ;;  %v326_v63 = vpop.permute.xlu0 %325 }
 0x206   :  { %v335_v0 = vmul.f32 %v838_v13, %v326_v63  ;;  %v339_v13 = vld [vmem:[#allocation2 + $0x10] sm:$0xff] }
 0x207   :  { %664 = vmatpush3.bf16.msra.mxu0 %v663_v60  ;;  %683 = vmatpush3.bf16.msra.mxu1 %v663_v60 }
 0x208   :  { %v665_v1 = vpack.c.bf16 %v336_v62, %v335_v0  ;;  %v280_v2 = vpop.permute.xlu1 %279 }
 0x209   :  { %v288_v3 = vmul.f32 %v833_v11, %v280_v2  ;;  %v278_v4 = vpop.permute.xlu0 %277 }
 0x20a   :  { %v287_v5 = vmul.f32 %v833_v11, %v278_v4  ;;  %666 = vmatprep.subr.bf16.mxu0 %v665_v1  ;;  %676 = vmatprep.subr.bf16.mxu1 %v665_v1  ;;  %v345_v11 = vld [vmem:[#allocation2 + $0x40] sm:$0xff] }
 0x20c   :  { %v667_v6 = vpack.c.bf16 %v288_v3, %v287_v5 }
 0x20e   :  { %668 = vmatpush3.bf16.msra.mxu0 %v667_v6  ;;  %684 = vmatpush3.bf16.msra.mxu1 %v667_v6 }
 0x211   :  { %450 = vmatmul.mubr.f32.vlgmr.msra.gmra.mrb[8].mxu0 %v337_v7  ;;  %460 = vmatmul.mubr.f32.vlgmr.msra.gmra.mrb[0].mxu1 %v341_v8 }
 0x212   :  { %454 = vmatprep.mubr.f32.mxu0 %v340_v9  ;;  %464 = vmatprep.mubr.f32.mxu1 %v344_v10 }
 0x215   :  { %455 = vmatmul.mubr.f32.gmra.mrb[10].mxu0 %v339_v13  ;;  %465 = vmatmul.mubr.f32.gmra.mrb[2].mxu1 %v343_v12 }
 0x216   :  { %469 = vmatprep.mubr.f32.mxu1 %v346_v14 }
 0x219   :  { %470 = vmatmul.mubr.f32.gmra.mrb[4].mxu1 %v345_v11  ;;  %v363_v19 = vpop.permute.xlu1 %362 }
 0x21a   :  { %474 = vmatprep.mubr.f32.mxu1 %v348_v15  ;;  %v358_v18 = vpop.permute.xlu0 %357 }
 0x21d   :  { %475 = vmatmul.mubr.f32.gmra.mrb[6].mxu1 %v347_v17  ;;  %v373_v37 = vpop.permute.xlu1 %372 }
 0x21e   :  { %v368_v26 = vpop.permute.xlu0 %367 }
 0x221   :  { %v383_v50 = vpop.permute.xlu1 %382 }
 0x222   :  { %v378_v45 = vpop.permute.xlu0 %377 }
 0x2e4   :  { %v591_v20 = vpop.f32.mrb[8].mxu0  ;;  %v597_v21 = vpop.f32.mrb[0].mxu1 }
 0x2e5   :  { %v592_v22 = vpop.f32.mrb[9].mxu0  ;;  %v598_v23 = vpop.f32.mrb[1].mxu1 }
 0x2e6   :  { %v593_v24 = vadd.f32 %v592_v22, %v591_v20  ;;  %v599_v25 = vadd.f32 %v598_v23, %v597_v21 }
 0x2e8   :  { %v452_v27 = vadd.f32 %v593_v24, %v358_v18  ;;  %v462_v28 = vadd.f32 %v599_v25, %v368_v26  ;;  %v594_v29 = vpop.f32.mrb[10].mxu0  ;;  %v600_v30 = vpop.f32.mrb[2].mxu1 }
 0x2e9   :  { %v595_v31 = vpop.f32.mrb[11].mxu0  ;;  %v601_v32 = vpop.f32.mrb[3].mxu1 }
 0x2ea   :  { %v541_v33 = vmul.f32 -1.442695, %v452_v27  ;;  %v543_v34 = vmul.f32 -1.442695, %v462_v28  ;;  %v596_v35 = vadd.f32 %v595_v31, %v594_v29  ;;  %v602_v36 = vadd.f32 %v601_v32, %v600_v30 }
 0x2ec   :  { %694 = vpow2.f32 %v541_v33  ;;  %v457_v38 = vadd.f32 %v596_v35, %v363_v19  ;;  %v467_v39 = vadd.f32 %v602_v36, %v373_v37  ;;  %v603_v40 = vpop.f32.mrb[4].mxu1 }
 0x2ed   :  { %696 = vpow2.f32 %v543_v34  ;;  %v604_v41 = vpop.f32.mrb[5].mxu1 }
 0x2ee   :  { %v542_v42 = vmul.f32 -1.442695, %v457_v38  ;;  %v544_v43 = vmul.f32 -1.442695, %v467_v39  ;;  %v605_v44 = vadd.f32 %v604_v41, %v603_v40 }
 0x2f0   :  { %698 = vpow2.f32 %v542_v42  ;;  %v472_v46 = vadd.f32 %v605_v44, %v378_v45  ;;  %v606_v16 = vpop.f32.mrb[6].mxu1 }
 0x2f1   :  { %700 = vpow2.f32 %v544_v43  ;;  %v607_v47 = vpop.f32.mrb[7].mxu1 }
 0x2f2   :  { %v545_v48 = vmul.f32 -1.442695, %v472_v46  ;;  %v608_v49 = vadd.f32 %v607_v47, %v606_v16 }
 0x2f4   :  { %702 = vpow2.f32 %v545_v48  ;;  %v477_v51 = vadd.f32 %v608_v49, %v383_v50 }
 0x2f6   :  { %v695_v52 = vpop.eup %694  ;;  %v546_v53 = vmul.f32 -1.442695, %v477_v51 }
 0x2f7   :  { %v697_v54 = vpop.eup %696  ;;  %v498_v55 = vadd.f32 1.0, %v695_v52 }
 0x2f8   :  { %v500_v56 = vadd.f32 1.0, %v697_v54  ;;  %704 = vpow2.f32 %v546_v53 }
 0x2f9   :  { %706 = vrcp.f32 %v498_v55 }
 0x2fa   :  { %v699_v57 = vpop.eup %698  ;;  %708 = vrcp.f32 %v500_v56 }
 0x2fb   :  { %v701_v58 = vpop.eup %700  ;;  %v499_v59 = vadd.f32 1.0, %v699_v57 }
 0x2fc   :  { %v501_v60 = vadd.f32 1.0, %v701_v58 }
 0x2fd   :  { %710 = vrcp.f32 %v499_v59 }
 0x2fe   :  { %v703_v61 = vpop.eup %702  ;;  %712 = vrcp.f32 %v501_v60 }
 0x2ff   :  { %v502_v62 = vadd.f32 1.0, %v703_v61 }
 0x301   :  { %714 = vrcp.f32 %v502_v62 }
 0x302   :  { %v705_v63 = vpop.eup %704 }
 0x303   :  { %v707_v0 = vpop.eup %706  ;;  %v503_v1 = vadd.f32 1.0, %v705_v63 }
 0x304   :  { %v709_v2 = vpop.eup %708  ;;  %516 = vst [vmem:[%s982_s6] sm:$0xff] %v707_v0 }
 0x305   :  { %518 = vst [vmem:[%s982_s6 + $0x10] sm:$0xff] %v709_v2  ;;  %716 = vrcp.f32 %v503_v1 }
 0x307   :  { %v711_v3 = vpop.eup %710 }
 0x308   :  { %v713_v4 = vpop.eup %712  ;;  %517 = vst [vmem:[%s982_s6 + $0x8] sm:$0xff] %v711_v3 }
 0x309   :  { %519 = vst [vmem:[%s982_s6 + $0x18] sm:$0xff] %v713_v4 }
 0x30b   :  { %v715_v5 = vpop.eup %714 }
 0x30c   :  { %520 = vst [vmem:[%s982_s6 + $0x20] sm:$0xff] %v715_v5 }
 0x30f   :  { %v717_v6 = vpop.eup %716 }
 0x310   :  { %521 = vst [vmem:[%s982_s6 + $0x28] sm:$0xff] %v717_v6 }
 0x311   :  { %526 = vsyncpa [#allocation3], 1 }

</bundles_post_ra>
